<compile_context>
chip_gen: v7x
topology: tpu7x:2x2x1
jax: 0.10.0
libtpu: 0.0.40
codegen_flags: <defaults>
</compile_context>

<pallas_src>
import functools

import jax
import jax.numpy as jnp
from jax.experimental import pallas as pl
from jax.experimental.pallas import tpu as pltpu


# ---------------------------------------------------------------------------
# Generation-aware budgets
# ---------------------------------------------------------------------------
@functools.lru_cache(maxsize=None)
def _vmem_capacity_bytes():
    try:
        return int(pltpu.get_tpu_info().vmem_capacity_bytes)
    except Exception:
        return 64 * 1024 * 1024  # conservative (v7x-sized) fallback


def _vmem_limit_bytes():
    # ~75% of physical VMEM leaves headroom for double buffers, semaphores and
    # compiler-internal scratch: 48 MiB on v7x, 96 MiB on v5e/v6e.
    return (_vmem_capacity_bytes() * 3) // 4


def _default_tiles():
    # ~8 MiB f32 blocks on 128 MiB-VMEM chips (v5e/v6e), ~4 MiB on v7x (64 MiB).
    if _vmem_capacity_bytes() >= 100 * 1024 * 1024:
        return 512, 4096
    return 512, 2048


def _round_up(n, m):
    return ((n + m - 1) // m) * m


def _divisor_tile(n, target, align):
    """Largest multiple of `align` that divides n (n % align == 0) and <= target."""
    t = max(align, (min(target, n) // align) * align)
    while n % t != 0:
        t -= align
    return t


def _choose_tiles(rows, cols, row_tile, col_tile):
    r_pad = _round_up(rows, 8)
    c_pad = _round_up(cols, 128)
    tc = _divisor_tile(c_pad, col_tile, 128)
    tr = _divisor_tile(r_pad, row_tile, 8)
    # Guarantee >= 2 row tiles (when possible) so the "parallel" row axis can be
    # sharded across v7x's two TensorCores (harmless on single-TC v5e/v6e).
    if r_pad // tr < 2 and r_pad >= 16:
        tr = _divisor_tile(r_pad, r_pad // 2, 8)
    return tr, tc, r_pad, c_pad


# ---------------------------------------------------------------------------
# Kernel 1: global average pool over the spatial axis of a (B*C, H*W) view.
# Grid = (row tiles [parallel], spatial tiles [arbitrary / reduction]).
# Bulk accumulation is lane-parallel on the VPU into a (tr, 128) scratch;
# the single cross-lane (XLU) reduce happens once per row tile at finalize.
# ---------------------------------------------------------------------------
def _pool_kernel(x_ref, o_ref, acc_ref, *, inv_n):
    j = pl.program_id(1)

    @pl.when(j == 0)
    def _():
        acc_ref[...] = jnp.zeros_like(acc_ref)

    n_chunks = x_ref.shape[1] // 128
    for k in range(n_chunks):  # static, unrolled; lane-dense 128-wide chunks
        acc_ref[...] += x_ref[:, k * 128:(k + 1) * 128].astype(jnp.float32)

    @pl.when(j == pl.num_programs(1) - 1)
    def _():
        o_ref[...] = jnp.sum(acc_ref[...], axis=1, keepdims=True) * inv_n


def _global_avg_pool(x2d_padded, *, true_cols, tr, tc):
    rows, cols = x2d_padded.shape
    grid = (rows // tr, cols // tc)
    kernel = functools.partial(_pool_kernel, inv_n=1.0 / float(true_cols))
    return pl.pallas_call(
        kernel,
        out_shape=jax.ShapeDtypeStruct((rows, 1), jnp.float32),
        grid_spec=pltpu.PrefetchScalarGridSpec(
            num_scalar_prefetch=0,
            grid=grid,
            in_specs=[pl.BlockSpec((tr, tc), lambda i, j: (i, j))],
            out_specs=pl.BlockSpec((tr, 1), lambda i, j: (i, 0)),
            scratch_shapes=[pltpu.VMEM((tr, 128), jnp.float32)],
        ),
        compiler_params=pltpu.CompilerParams(
            dimension_semantics=("parallel", "arbitrary"),
            vmem_limit_bytes=_vmem_limit_bytes(),
        ),
        cost_estimate=pl.CostEstimate(
            flops=rows * cols,
            transcendentals=0,
            bytes_accessed=rows * cols * x2d_padded.dtype.itemsize + rows * 4,
        ),
    )(x2d_padded)


# ---------------------------------------------------------------------------
# Kernel 2: channel-wise rescale.  x2d: (B*C, H*W), s: (B*C, 1) broadcast over
# the lane (spatial) axis -> lane-dense loads/stores; both grid axes parallel.
# Multiply in the input dtype (s pre-cast in the wrapper; no f32 upcast).
# ---------------------------------------------------------------------------
def _rescale_kernel(x_ref, s_ref, o_ref):
    o_ref[...] = x_ref[...] * s_ref[...]


def _rescale(x2d_padded, s_col, *, tr, tc):
    rows, cols = x2d_padded.shape
    grid = (rows // tr, cols // tc)
    itemsize = x2d_padded.dtype.itemsize
    return pl.pallas_call(
        _rescale_kernel,
        out_shape=jax.ShapeDtypeStruct((rows, cols), x2d_padded.dtype),
        grid_spec=pltpu.PrefetchScalarGridSpec(
            num_scalar_prefetch=0,
            grid=grid,
            in_specs=[pl.BlockSpec((tr, tc), lambda i, j: (i, j)),
                      pl.BlockSpec((tr, 1), lambda i, j: (i, 0))],
            out_specs=pl.BlockSpec((tr, tc), lambda i, j: (i, j)),
        ),
        compiler_params=pltpu.CompilerParams(
            dimension_semantics=("parallel", "parallel"),
            vmem_limit_bytes=_vmem_limit_bytes(),
        ),
        cost_estimate=pl.CostEstimate(
            flops=rows * cols,
            transcendentals=0,
            bytes_accessed=2 * rows * cols * itemsize + rows * itemsize,
        ),
    )(x2d_padded, s_col)


# ---------------------------------------------------------------------------
# SELayerV2 forward.
#   x:   (B, C, H, W)               NCHW, no transpose needed
#   wb:  (C, 4*C//reduction)        fused branch weights = concat of the four
#                                   per-branch (in, out) = PyTorch weight.T
#   wfc: (4*C//reduction, C)        final FC weight as (in, out)
# ---------------------------------------------------------------------------
def fuse_branch_weights(w1, w2, w3, w4):
    """Hoisted out of the forward path (perf review): fuse the 4 FC branches once."""
    return jnp.concatenate([w1, w2, w3, w4], axis=1)


def se_layer_v2(x, wb, wfc, *, row_tile=None, col_tile=None):
    B, C, H, W = x.shape
    R, S = B * C, H * W
    if row_tile is None or col_tile is None:
        d_rt, d_ct = _default_tiles()
        row_tile = row_tile or d_rt
        col_tile = col_tile or d_ct
    tr, tc, r_pad, c_pad = _choose_tiles(R, S, row_tile, col_tile)

    x2d = x.reshape(R, S)              # contiguous lane-dense view (spatial on lanes)
    if (r_pad, c_pad) != (R, S):       # zero-pad to tile-friendly shape
        x2d_p = jnp.pad(x2d, ((0, r_pad - R), (0, c_pad - S)))
    else:
        x2d_p = x2d

    # 1) global average pool (Pallas, mem-bound, tiled).  Zero padding is safe:
    #    inv_n uses the true H*W.
    pooled = _global_avg_pool(x2d_p, true_cols=S, tr=tr, tc=tc)    # (r_pad, 1) f32
    y = pooled[:R].reshape(B, C)

    # 2) excitation: two tiny matmuls + relu + sigmoid on a (B, C) vector.
    #    Kept in plain jnp per the perf review (latency-bound; drops one launch
    #    and the HBM round-trip of s; XLA fuses it).
    h = jnp.maximum(jnp.dot(y, wb), 0.0)
    s = jax.nn.sigmoid(jnp.dot(h, wfc))                            # (B, C) f32

    s_col = s.reshape(R, 1).astype(x.dtype)
    if r_pad != R:
        s_col = jnp.pad(s_col, ((0, r_pad - R), (0, 0)))

    # 3) channel-wise rescale (Pallas, mem-bound, tiled, both axes parallel).
    out_p = _rescale(x2d_p, s_col, tr=tr, tc=tc)
    return out_p[:R, :S].reshape(B, C, H, W)


# ---------------------------------------------------------------------------
# Pure-JAX reference (keeps the 4 separate branches, matching the PyTorch code)
# ---------------------------------------------------------------------------
def _ref_forward(x, w1, w2, w3, w4, wfc):
    y = jnp.mean(x, axis=(2, 3))                         # AdaptiveAvgPool2d(1)
    ys = [jnp.maximum(y @ w, 0.0) for w in (w1, w2, w3, w4)]
    s = jax.nn.sigmoid(jnp.concatenate(ys, axis=1) @ wfc)
    return x * s[:, :, None, None]


def _run_case(key, B, C, H, W, reduction):
    cr = C // reduction
    kx, k1, k2, k3, k4, kf = jax.random.split(key, 6)
    x = jax.random.normal(kx, (B, C, H, W), jnp.float32)
    w1 = 0.3 * jax.random.normal(k1, (C, cr), jnp.float32)
    w2 = 0.3 * jax.random.normal(k2, (C, cr), jnp.float32)
    w3 = 0.3 * jax.random.normal(k3, (C, cr), jnp.float32)
    w4 = 0.3 * jax.random.normal(k4, (C, cr), jnp.float32)
    wfc = 0.3 * jax.random.normal(kf, (4 * cr, C), jnp.float32)

    wb = fuse_branch_weights(w1, w2, w3, w4)   # precomputed once, outside the forward
    out = jax.block_until_ready(jax.jit(se_layer_v2)(x, wb, wfc))
    ref = jax.block_until_ready(_ref_forward(x, w1, w2, w3, w4, wfc))

    assert out.shape == (B, C, H, W), out.shape
    assert bool(jnp.all(jnp.isfinite(out)))
    err = float(jnp.max(jnp.abs(out - ref)))
    assert err < 1e-4, err


if __name__ == "__main__":
    key = jax.random.PRNGKey(0)
    k0, k1 = jax.random.split(key)
    # Aligned shape (H*W already a multiple of 128).
    _run_case(k0, B=2, C=32, H=16, W=16, reduction=16)
    # Non-aligned shape (H*W = 25 -> padded to 128): exercises the padding path.
    _run_case(k1, B=3, C=16, H=5, W=5, reduction=16)
    print("KERNEL_OK")
</pallas_src>

<mosaic_0001>
module attributes {stable_mosaic.version = 11 : i64} {
  func.func @_pool_kernel(%arg0: i32, %arg1: i32, %arg2: memref<32x256xf32, #tpu.memory_space<vmem>>, %arg3: memref<32x1xf32, #tpu.memory_space<vmem>>, %arg4: memref<32x128xf32, #tpu.memory_space<vmem>>) attributes {dimension_semantics = [#tpu.dimension_semantics<parallel>, #tpu.dimension_semantics<arbitrary>], iteration_bounds = array<i64: 2, 1>, scalar_prefetch = 0 : i64, scratch_operands = 1 : i64, tpu.core_type = #tpu.core_type<tc>, window_params = [{transform_indices = @transform_0, window_bounds = array<i64: 32, 256>}, {transform_indices = @transform_1, window_bounds = array<i64: 32, 1>}]} {
    %c0_i32 = arith.constant 0 : i32
    %0 = arith.cmpi eq, %arg1, %c0_i32 : i32
    %1 = arith.extui %0 : i1 to i32
    %c0_i32_0 = arith.constant 0 : i32
    %2 = arith.cmpi ne, %1, %c0_i32_0 : i32
    scf.if %2 {
      %cst = arith.constant 0.000000e+00 : f32
      %14 = vector.broadcast %cst : f32 to vector<32x128xf32>
      %c0_13 = arith.constant 0 : index
      %c0_14 = arith.constant 0 : index
      %15 = vector.load %arg4[%c0_13, %c0_14] : memref<32x128xf32, #tpu.memory_space<vmem>>, vector<32x128xf32>
      tpu.vector_store %arg4[%c0_13, %c0_14], %14 {strides = array<i32>} : memref<32x128xf32, #tpu.memory_space<vmem>>, vector<32x128xf32>,
    } else {
    }
    %c0 = arith.constant 0 : index
    %c0_1 = arith.constant 0 : index
    %3 = vector.load %arg4[%c0, %c0_1] : memref<32x128xf32, #tpu.memory_space<vmem>>, vector<32x128xf32>
    %c0_2 = arith.constant 0 : index
    %c0_3 = arith.constant 0 : index
    %4 = vector.load %arg2[%c0_2, %c0_3] : memref<32x256xf32, #tpu.memory_space<vmem>>, vector<32x128xf32>
    %5 = arith.addf %3, %4 : vector<32x128xf32>
    %c0_4 = arith.constant 0 : index
    %c0_5 = arith.constant 0 : index
    %6 = vector.load %arg4[%c0_4, %c0_5] : memref<32x128xf32, #tpu.memory_space<vmem>>, vector<32x128xf32>
    tpu.vector_store %arg4[%c0_4, %c0_5], %5 {strides = array<i32>} : memref<32x128xf32, #tpu.memory_space<vmem>>, vector<32x128xf32>,
    %c0_6 = arith.constant 0 : index
    %c0_7 = arith.constant 0 : index
    %7 = vector.load %arg4[%c0_6, %c0_7] : memref<32x128xf32, #tpu.memory_space<vmem>>, vector<32x128xf32>
    %c0_8 = arith.constant 0 : index
    %c128 = arith.constant 128 : index
    %8 = vector.load %arg2[%c0_8, %c128] : memref<32x256xf32, #tpu.memory_space<vmem>>, vector<32x128xf32>
    %9 = arith.addf %7, %8 : vector<32x128xf32>
    %c0_9 = arith.constant 0 : index
    %c0_10 = arith.constant 0 : index
    %10 = vector.load %arg4[%c0_9, %c0_10] : memref<32x128xf32, #tpu.memory_space<vmem>>, vector<32x128xf32>
    tpu.vector_store %arg4[%c0_9, %c0_10], %9 {strides = array<i32>} : memref<32x128xf32, #tpu.memory_space<vmem>>, vector<32x128xf32>,
    %c0_i32_11 = arith.constant 0 : i32
    %11 = arith.cmpi eq, %arg1, %c0_i32_11 : i32
    %12 = arith.extui %11 : i1 to i32
    %c0_i32_12 = arith.constant 0 : i32
    %13 = arith.cmpi ne, %12, %c0_i32_12 : i32
    scf.if %13 {
      %c0_13 = arith.constant 0 : index
      %c0_14 = arith.constant 0 : index
      %14 = vector.load %arg4[%c0_13, %c0_14] : memref<32x128xf32, #tpu.memory_space<vmem>>, vector<32x128xf32>
      %cst = arith.constant dense<0.000000e+00> : vector<32xf32>
      %15 = vector.multi_reduction <add>, %14, %cst [1] : vector<32x128xf32> to vector<32xf32>
      %16 = vector.shape_cast %15 : vector<32xf32> to vector<32x1xf32>
      %cst_15 = arith.constant 3.906250e-03 : f32
      %17 = vector.broadcast %cst_15 : f32 to vector<32x1xf32>
      %18 = arith.mulf %16, %17 : vector<32x1xf32>
      %c0_16 = arith.constant 0 : index
      %c0_17 = arith.constant 0 : index
      %19 = vector.load %arg3[%c0_16, %c0_17] : memref<32x1xf32, #tpu.memory_space<vmem>>, vector<32x1xf32>
      tpu.vector_store %arg3[%c0_16, %c0_17], %18 {strides = array<i32>} : memref<32x1xf32, #tpu.memory_space<vmem>>, vector<32x1xf32>,
    } else {
    }
    return
  }
  func.func @transform_0(%arg0: i32, %arg1: i32) -> (i32, i32) {
    %c0_i32 = arith.constant 0 : i32
    return %arg0, %arg1 : i32, i32
  }
  func.func @transform_1(%arg0: i32, %arg1: i32) -> (i32, i32) {
    %c0_i32 = arith.constant 0 : i32
    %c0_i32_0 = arith.constant 0 : i32
    return %arg0, %c0_i32 : i32, i32
  }
}

module attributes {stable_mosaic.version = 11 : i64} {
  func.func @_rescale_kernel(%arg0: i32, %arg1: i32, %arg2: memref<32x256xf32, #tpu.memory_space<vmem>>, %arg3: memref<32x1xf32, #tpu.memory_space<vmem>>, %arg4: memref<32x256xf32, #tpu.memory_space<vmem>>) attributes {dimension_semantics = [#tpu.dimension_semantics<parallel>, #tpu.dimension_semantics<parallel>], iteration_bounds = array<i64: 2, 1>, scalar_prefetch = 0 : i64, scratch_operands = 0 : i64, tpu.core_type = #tpu.core_type<tc>, window_params = [{transform_indices = @transform_0, window_bounds = array<i64: 32, 256>}, {transform_indices = @transform_1, window_bounds = array<i64: 32, 1>}, {transform_indices = @transform_2, window_bounds = array<i64: 32, 256>}]} {
    %c0 = arith.constant 0 : index
    %c0_0 = arith.constant 0 : index
    %0 = vector.load %arg2[%c0, %c0_0] : memref<32x256xf32, #tpu.memory_space<vmem>>, vector<32x256xf32>
    %c0_1 = arith.constant 0 : index
    %c0_2 = arith.constant 0 : index
    %1 = vector.load %arg3[%c0_1, %c0_2] : memref<32x1xf32, #tpu.memory_space<vmem>>, vector<32x1xf32>
    %2 = vector.broadcast %1 : vector<32x1xf32> to vector<32x256xf32>
    %3 = arith.mulf %0, %2 : vector<32x256xf32>
    %c0_3 = arith.constant 0 : index
    %c0_4 = arith.constant 0 : index
    %4 = vector.load %arg4[%c0_3, %c0_4] : memref<32x256xf32, #tpu.memory_space<vmem>>, vector<32x256xf32>
    tpu.vector_store %arg4[%c0_3, %c0_4], %3 {strides = array<i32>} : memref<32x256xf32, #tpu.memory_space<vmem>>, vector<32x256xf32>,
    return
  }
  func.func @transform_0(%arg0: i32, %arg1: i32) -> (i32, i32) {
    %c0_i32 = arith.constant 0 : i32
    return %arg0, %arg1 : i32, i32
  }
  func.func @transform_1(%arg0: i32, %arg1: i32) -> (i32, i32) {
    %c0_i32 = arith.constant 0 : i32
    %c0_i32_0 = arith.constant 0 : i32
    return %arg0, %c0_i32 : i32, i32
  }
  func.func @transform_2(%arg0: i32, %arg1: i32) -> (i32, i32) {
    %c0_i32 = arith.constant 0 : i32
    return %arg0, %arg1 : i32, i32
  }
}

</mosaic_0001>

<bundles_post_ra>
// kernel: se_layer_v2.2
= control target key start
LH: loop header
LB: loop body
LE: loop exit
PB: predicated region body
PF: predicated region fallthrough
CT: control target
= control target key end

     0   :  { %s357_s6 = smov 0   ;;  %s359_s7 = smov 0   ;;  %s390_s0 = inlined_call_operand.vmem [shape: f32[64,256], index: 0, kind: input, shape index: {}]   ;;  %s391_s1 = inlined_call_operand.vmem [shape: f32[64,1], index: 1, kind: output, shape index: {}]  }
   0x1   :  { %s361_s8 = smov 0  }
   0x2 LB: > { %s23_s9 = sadd.s32 1, %s341_s7  ;;  %p290_p0 = scmp.ge.s32.totalorder %s345_s8, 1  ;;  %s345_s8 = sphi %s361_s8, %s11_s8   ;;  %s341_s7 = sphi %s359_s7, %s393_s7   ;;  %s337_s6 = sphi %s357_s6, %s392_s6  }
   0x3   : > { %p25_p1 = scmp.ge.s32.totalorder %s23_s9, 2  ;;  %p108_p2 = scmp.lt.s32.totalorder %s345_s8, 3 }
   0x5   : > { %s395_s9 = smov (%p25_p1, %s23_s9), 0  ;;  %p109_p3 = pnand %p290_p0, %p108_p2 }
   0x6   : > { %s291_s10 = sshll.u32 (!%p109_p3), %s337_s6, 2  ;;  %vm210_vm0 = vcmask (!%p109_p3), 7168  }
   0x7   : > { %112 = sbr.rel (%p109_p3) target bundleno = 170 (0xaa), region = 24  ;;  %p135_p4 = scmp.lt.s32.totalorder (!%p109_p3), %s291_s10, 7 }
   0xe   : > { %s397_s10 = smov (!%p135_p4, %s291_s10), 7 }
   0xf   : > { %s298_s11 = sshll.u32 %s397_s10, 4  ;;  %s295_s15 = sshll.u32 %s397_s10, 3 }
  0x10   : > { %s142_s14 = scalar_lea.vmem %s390_s0, %s298_s11  ;;  %s149_s18 = scalar_lea.vmem %s391_s1, %s295_s15 }
  0x11   : > { %v163_v0 = vld [vmem:[%s142_s14] sm:$0xff]  ;;  %v179_v1 = vld [vmem:[%s142_s14 + $0x8] sm:$0xff]  ;;  %v164_v5 = vld [vmem:[%s142_s14 + $0x10] sm:$0xff] }
  0x12   : > { %v165_v2 = vld [vmem:[%s142_s14 + $0x20] sm:$0xff]  ;;  %v183_v3 = vadd.f32 %v179_v1, %v163_v0  ;;  %v181_v4 = vld [vmem:[%s142_s14 + $0x28] sm:$0xff]  ;;  %v180_v6 = vld [vmem:[%s142_s14 + $0x18] sm:$0xff] }
  0x13   : > { %v185_v7 = vadd.f32 %v181_v4, %v165_v2  ;;  %v166_v8 = vld [vmem:[%s142_s14 + $0x30] sm:$0xff]  ;;  %v182_v9 = vld [vmem:[%s142_s14 + $0x38] sm:$0xff]  ;;  %v184_v10 = vadd.f32 %v180_v6, %v164_v5 }
  0x14   : > { %198 = vadd.xlane.f32.xlu0 %v183_v3  ;;  %v186_v11 = vadd.f32 %v182_v9, %v166_v8 }
  0x15   : > { %202 = vadd.xlane.f32.xlu1 %v185_v7 }
  0x18   : > { %200 = vadd.xlane.f32.xlu0 %v184_v10 }
  0x19   : > { %204 = vadd.xlane.f32.xlu1 %v186_v11 }
  0xa1   : > { %v199_v12 = vpop.xlane.xlu0 %198 }
  0xa2   : > { %v206_v13 = vmul.f32 0.00390625, %v199_v12  ;;  %v203_v14 = vpop.xlane.xlu1 %202 }
  0xa3   : > { %v208_v18 = vmul.f32 0.00390625, %v203_v14 }
  0xa4   : > { %211 = vst.msk [vmem:[%s149_s18] sm:$0xff] %vm210_vm0, %v206_v13 }
  0xa5   : > { %v201_v15 = vpop.xlane.xlu0 %200  ;;  %213 = vst.msk [vmem:[%s149_s18 + $0x10] sm:$0xff] %vm210_vm0, %v208_v18 }
  0xa6   : > { %v207_v16 = vmul.f32 0.00390625, %v201_v15  ;;  %v205_v17 = vpop.xlane.xlu1 %204 }
  0xa7   : > { %v209_v19 = vmul.f32 0.00390625, %v205_v17 }
  0xa8   : > { %212 = vst.msk [vmem:[%s149_s18 + $0x8] sm:$0xff] %vm210_vm0, %v207_v16 }
  0xa9   : > { %214 = vst.msk [vmem:[%s149_s18 + $0x18] sm:$0xff] %vm210_vm0, %v209_v19 }
  0xaa PF: > { %s11_s8 = sadd.s32 1, %s345_s8   ;;  %s392_s6 = smov %s341_s7 }
  0xab   : > { %p8_p5 = scmp.ge.s32.totalorder %s11_s8, 4   ;;  %s393_s7 = smov %s395_s9 }
  0xad   :  { %10 = sbr.rel (!%p8_p5) target bundleno = 2 (0x2), region = 62 }

// kernel: se_layer_v2.3
= control target key start
LH: loop header
LB: loop body
LE: loop exit
PB: predicated region body
PF: predicated region fallthrough
CT: control target
= control target key end

     0   :  { %s447_s9 = smov 0   ;;  %s449_s10 = smov 0   ;;  %s483_s0 = inlined_call_operand.vmem [shape: f32[64,256], index: 0, kind: input, shape index: {}]   ;;  %s484_s1 = inlined_call_operand.vmem [shape: f32[64,1], index: 1, kind: input, shape index: {}]   ;;  %s485_s2 = inlined_call_operand.vmem [shape: f32[64,256], index: 2, kind: output, shape index: {}]  }
   0x1   :  { %s451_s11 = smov 0  }
   0x2 LB: > { %s24_s12 = sadd.s32 1, %s425_s10  ;;  %p367_p0 = scmp.ge.s32.totalorder %s429_s11, 1  ;;  %s429_s11 = sphi %s451_s11, %s12_s11   ;;  %s425_s10 = sphi %s449_s10, %s487_s10   ;;  %s421_s9 = sphi %s447_s9, %s486_s9  }
   0x3   : > { %p26_p1 = scmp.ge.s32.totalorder %s24_s12, 2  ;;  %p146_p2 = scmp.lt.s32.totalorder %s429_s11, 3 }
   0x5   : > { %s489_s12 = smov (%p26_p1, %s24_s12), 0  ;;  %p147_p3 = pnand %p367_p0, %p146_p2 }
   0x6   : > { %s368_s13 = sshll.u32 (!%p147_p3), %s421_s9, 2  ;;  %v431_v0 = vmov (!%p147_p3), 0  }
   0x7   : > { %150 = sbr.rel (%p147_p3) target bundleno = 154 (0x9a), region = 28  ;;  %406 = vset.pattern.permute.xlu1 (!%p147_p3), %v431_v0  ;;  %405 = vset.pattern.permute.xlu0 (!%p147_p3), %v431_v0  ;;  %p185_p4 = scmp.lt.s32.totalorder (!%p147_p3), %s368_s13, 7 }
   0xe   : > { %s491_s13 = smov (!%p185_p4, %s368_s13), 7 }
   0xf   : > { %s372_s14 = sshll.u32 %s491_s13, 3  ;;  %s378_s18 = sshll.u32 %s491_s13, 4 }
  0x10   : > { %s199_s17 = scalar_lea.vmem %s484_s1, %s372_s14  ;;  %s192_s21 = scalar_lea.vmem %s483_s0, %s378_s18 }
  0x11   : > { %v223_v1 = vld [vmem:[%s199_s17 + $0x10] sm:$0xff]  ;;  %v221_v2 = vld [vmem:[%s199_s17] sm:$0xff]  ;;  %v224_v3 = vld [vmem:[%s199_s17 + $0x18] sm:$0xff]  ;;  %s210_s24 = scalar_lea.vmem %s485_s2, %s378_s18 }
  0x12   : > { %237 = vperm.xlu1 %406, %v223_v1   ;;  %227 = vperm.xlu0 %405, %v221_v2   ;;  %v222_v4 = vld [vmem:[%s199_s17 + $0x8] sm:$0xff]  ;;  %v213_v5 = vld [vmem:[%s192_s21] sm:$0xff]  ;;  %v215_v11 = vld [vmem:[%s192_s21 + $0x10] sm:$0xff] }
  0x13   : > { %v214_v6 = vld [vmem:[%s192_s21 + $0x8] sm:$0xff]  ;;  %v216_v12 = vld [vmem:[%s192_s21 + $0x18] sm:$0xff]  ;;  %v217_v13 = vld [vmem:[%s192_s21 + $0x20] sm:$0xff] }
  0x14   : > { %v218_v14 = vld [vmem:[%s192_s21 + $0x28] sm:$0xff]  ;;  %v219_v16 = vld [vmem:[%s192_s21 + $0x30] sm:$0xff]  ;;  %v220_v17 = vld [vmem:[%s192_s21 + $0x38] sm:$0xff] }
  0x16   : > { %242 = vperm.xlu1 %406, %v224_v3   ;;  %232 = vperm.xlu0 %405, %v222_v4  }
  0x91   : > { %v238_v7 = vpop.permute.xlu1 %237  ;;  %v228_v8 = vpop.permute.xlu0 %227 }
  0x92   : > { %v245_v9 = vmul.f32 %v228_v8, %v213_v5  ;;  %v246_v10 = vmul.f32 %v228_v8, %v214_v6  ;;  %v249_v21 = vmul.f32 %v238_v7, %v217_v13  ;;  %v250_v22 = vmul.f32 %v238_v7, %v218_v14 }
  0x94   : > { %253 = vst [vmem:[%s210_s24] sm:$0xff] %v245_v9  ;;  %254 = vst [vmem:[%s210_s24 + $0x8] sm:$0xff] %v246_v10 }
  0x95   : > { %v243_v15 = vpop.permute.xlu1 %242  ;;  %v233_v18 = vpop.permute.xlu0 %232  ;;  %257 = vst [vmem:[%s210_s24 + $0x20] sm:$0xff] %v249_v21  ;;  %258 = vst [vmem:[%s210_s24 + $0x28] sm:$0xff] %v250_v22 }
  0x96   : > { %v247_v19 = vmul.f32 %v233_v18, %v215_v11  ;;  %v248_v20 = vmul.f32 %v233_v18, %v216_v12  ;;  %v251_v23 = vmul.f32 %v243_v15, %v219_v16  ;;  %v252_v24 = vmul.f32 %v243_v15, %v220_v17 }
  0x98   : > { %255 = vst [vmem:[%s210_s24 + $0x10] sm:$0xff] %v247_v19  ;;  %256 = vst [vmem:[%s210_s24 + $0x18] sm:$0xff] %v248_v20 }
  0x99   : > { %259 = vst [vmem:[%s210_s24 + $0x30] sm:$0xff] %v251_v23  ;;  %260 = vst [vmem:[%s210_s24 + $0x38] sm:$0xff] %v252_v24 }
  0x9a PF: > { %s12_s11 = sadd.s32 1, %s429_s11   ;;  %s486_s9 = smov %s425_s10 }
  0x9b   : > { %p9_p5 = scmp.ge.s32.totalorder %s12_s11, 4   ;;  %s487_s10 = smov %s489_s12 }
  0x9d   :  { %11 = sbr.rel (!%p9_p5) target bundleno = 2 (0x2), region = 61 }

</bundles_post_ra>
